<compile_context>
chip_gen: v7x
topology: tpu7x:2x2x1
jax: 0.10.0
libtpu: 0.0.40
codegen_flags: <defaults>
</compile_context>

<pallas_src>
import jax
import jax.numpy as jnp
from jax.experimental import pallas as pl
from jax.experimental.pallas import tpu as pltpu

_LANE = 128
_SUBLANE = 8


def _neighbor_elements_kernel(z_ref, nbr_ref, out_ref):
    """z_ref: (1, 1, A_pad) f32, nbr_ref/out_ref: (1, row_tile, 128)."""
    a_pad = z_ref.shape[-1]
    row_tile = nbr_ref.shape[1]
    num_chunks = a_pad // _LANE
    num_slabs = row_tile // _SUBLANE

    z = z_ref[0]  # (1, A_pad) f32

    # Hoist the sublane-broadcast table chunks out of the slab loop
    # (broadcast_in_dim is not CSE'd by JAX; emit each chunk exactly once).
    tables = [
        jnp.broadcast_to(z[:, c * _LANE:(c + 1) * _LANE], (_SUBLANE, _LANE))
        for c in range(num_chunks)
    ]

    for s in range(num_slabs):
        idx = nbr_ref[0, s * _SUBLANE:(s + 1) * _SUBLANE, :]  # (8, 128) i32
        if num_chunks == 1:
            # Single-chunk fast path (A <= 128): one XLU lane gather per vreg.
            safe = jnp.clip(idx, 0, _LANE - 1)
            g = jnp.take_along_axis(tables[0], safe, axis=1,
                                    mode="promise_in_bounds")
        else:
            # Chunked table (A > 128): lane gather per 128-lane chunk + select.
            g = jnp.zeros((_SUBLANE, _LANE), jnp.float32)
            for c in range(num_chunks):
                local = idx - c * _LANE
                safe = jnp.clip(local, 0, _LANE - 1)
                gathered = jnp.take_along_axis(tables[c], safe, axis=1,
                                               mode="promise_in_bounds")
                in_chunk = (local >= 0) & (local < _LANE)
                g = jnp.where(in_chunk, gathered, g)
        out_ref[0, s * _SUBLANE:(s + 1) * _SUBLANE, :] = g


def neighbor_elements_pallas(atomic_numbers, neighbors, *, row_tile=128):
    """Pallas equivalent of neighbor_elements(atomic_numbers, neighbors).

    atomic_numbers: (B, A, 1) (or (B, A)) -- any numeric dtype
    neighbors:      (B, A, N) integer indices into the A axis (values in [0, A))
    returns:        (B, A, N, 1) (resp. (B, A, N)) with atomic_numbers' dtype
    """
    orig_dtype = atomic_numbers.dtype
    B, A = atomic_numbers.shape[0], atomic_numbers.shape[1]
    trailing = atomic_numbers.shape[2:]
    feat = 1
    for d in trailing:
        feat *= d
    assert feat == 1, "per-atom property must be scalar (trailing dims of size 1)"
    N = neighbors.shape[-1]
    K = A * N

    # --- per-atom table: one lane-dense f32 row, padded to a multiple of 128 ---
    a_pad = max(_LANE, pl.cdiv(A, _LANE) * _LANE)
    z_row = atomic_numbers.reshape(B, 1, A).astype(jnp.float32)
    if a_pad != A:
        z_row = jnp.pad(z_row, ((0, 0), (0, 0), (0, a_pad - A)))

    # --- flat neighbor axis presented as (B, rows, 128): sublane+lane dense ---
    rows = pl.cdiv(K, _LANE)
    rows8 = pl.cdiv(rows, _SUBLANE) * _SUBLANE
    tile = max(_SUBLANE, (min(int(row_tile), rows8) // _SUBLANE) * _SUBLANE)
    # v7x megacore: keep >= 2 parallel grid steps when there is only one batch row.
    if B == 1 and rows8 > _SUBLANE and rows8 // tile < 2:
        tile = max(_SUBLANE, pl.cdiv(rows8 // 2, _SUBLANE) * _SUBLANE)
    rows_pad = pl.cdiv(rows8, tile) * tile

    nbr_flat = neighbors.astype(jnp.int32).reshape(B, K)
    pad_k = rows_pad * _LANE - K
    if pad_k:
        nbr_flat = jnp.pad(nbr_flat, ((0, 0), (0, pad_k)))  # padded slots gather atom 0
    nbr_2d = nbr_flat.reshape(B, rows_pad, _LANE)

    grid = (B, rows_pad // tile)

    out_2d = pl.pallas_call(
        _neighbor_elements_kernel,
        out_shape=jax.ShapeDtypeStruct((B, rows_pad, _LANE), jnp.float32),
        grid_spec=pltpu.PrefetchScalarGridSpec(
            num_scalar_prefetch=0,
            grid=grid,
            in_specs=[
                pl.BlockSpec((1, 1, a_pad), lambda b, t: (b, 0, 0)),      # atom table
                pl.BlockSpec((1, tile, _LANE), lambda b, t: (b, t, 0)),   # neighbor ids
            ],
            out_specs=pl.BlockSpec((1, tile, _LANE), lambda b, t: (b, t, 0)),
        ),
        compiler_params=pltpu.CompilerParams(
            dimension_semantics=("parallel", "parallel")),
    )(z_row, nbr_2d)

    # Wrapper-side relayout back to the torch-shaped output (kept for parity with
    # the reference module; consumers that accept the lane-dense (B, K) slab can
    # skip this reshape).
    out = out_2d.reshape(B, rows_pad * _LANE)[:, :K].reshape((B, A, N) + trailing)
    if jnp.issubdtype(orig_dtype, jnp.integer):
        # values are small integers, exactly representable in f32
        out = jnp.round(out).astype(orig_dtype)
    else:
        out = out.astype(orig_dtype)
    return out


class NeighborElements:
    """JAX/Pallas port of the torch NeighborElements module."""

    def __call__(self, atomic_numbers, neighbors):
        return neighbor_elements_pallas(atomic_numbers, neighbors)


def _neighbor_elements_ref(atomic_numbers, neighbors):
    """Pure-JAX reference replicating the torch forward exactly."""
    B = atomic_numbers.shape[0]
    idx_b = jnp.arange(B)[:, None, None]
    return atomic_numbers[idx_b, neighbors]


if __name__ == "__main__":
    key = jax.random.PRNGKey(0)
    k1, k2, k3, k4, k5 = jax.random.split(key, 5)

    layer = NeighborElements()

    # Test 1: small molecule, integer atomic numbers (A <= 128 single-chunk path).
    B, A, N = 2, 8, 8
    atomic_numbers = jax.random.randint(k1, (B, A, 1), 1, 119).astype(jnp.int32)
    neighbors = jax.random.randint(k2, (B, A, N), 0, A).astype(jnp.int32)
    out = jax.block_until_ready(layer(atomic_numbers, neighbors))
    ref = _neighbor_elements_ref(atomic_numbers, neighbors)
    assert out.shape == (B, A, N, 1) and out.dtype == atomic_numbers.dtype, (
        out.shape, out.dtype)
    assert jnp.array_equal(out, ref), "int gather mismatch"

    # Test 2: float-property gather (gather path does no arithmetic -> bit-exact).
    props = jax.random.normal(k3, (B, A, 1), jnp.float32)
    out_f = jax.block_until_ready(neighbor_elements_pallas(props, neighbors))
    assert jnp.array_equal(out_f, _neighbor_elements_ref(props, neighbors)), (
        "float gather mismatch")

    # Test 3: A > 128 exercises the chunked-table path.
    B2, A2, N2 = 2, 150, 16
    z2 = jax.random.randint(k4, (B2, A2, 1), 1, 119).astype(jnp.int32)
    nb2 = jax.random.randint(k5, (B2, A2, N2), 0, A2).astype(jnp.int32)
    out2 = jax.block_until_ready(layer(z2, nb2))
    assert jnp.array_equal(out2, _neighbor_elements_ref(z2, nb2)), (
        "chunked gather mismatch")

    print("KERNEL_OK")
</pallas_src>

<mosaic_0001>
module attributes {stable_mosaic.version = 11 : i64} {
  func.func @_neighbor_elements_kernel(%arg0: i32, %arg1: i32, %arg2: memref<1x1x128xf32, #tpu.memory_space<vmem>>, %arg3: memref<1x8x128xi32, #tpu.memory_space<vmem>>, %arg4: memref<1x8x128xf32, #tpu.memory_space<vmem>>) attributes {dimension_semantics = [#tpu.dimension_semantics<parallel>, #tpu.dimension_semantics<parallel>], iteration_bounds = array<i64: 2, 1>, scalar_prefetch = 0 : i64, scratch_operands = 0 : i64, tpu.core_type = #tpu.core_type<tc>, window_params = [{transform_indices = @transform_0, window_bounds = array<i64: 1, 1, 128>}, {transform_indices = @transform_1, window_bounds = array<i64: 1, 8, 128>}, {transform_indices = @transform_2, window_bounds = array<i64: 1, 8, 128>}]} {
    %c0 = arith.constant 0 : index
    %c0_0 = arith.constant 0 : index
    %c0_1 = arith.constant 0 : index
    %0 = vector.load %arg2[%c0, %c0_0, %c0_1] : memref<1x1x128xf32, #tpu.memory_space<vmem>>, vector<1x1x128xf32>
    %1 = vector.shape_cast %0 : vector<1x1x128xf32> to vector<1x128xf32>
    %2 = vector.shape_cast %1 : vector<1x128xf32> to vector<1x128xf32>
    %3 = vector.broadcast %2 : vector<1x128xf32> to vector<8x128xf32>
    %c0_2 = arith.constant 0 : index
    %c0_3 = arith.constant 0 : index
    %c0_4 = arith.constant 0 : index
    %4 = vector.load %arg3[%c0_2, %c0_3, %c0_4] : memref<1x8x128xi32, #tpu.memory_space<vmem>>, vector<1x8x128xi32>
    %5 = vector.shape_cast %4 : vector<1x8x128xi32> to vector<8x128xi32>
    %c0_i32 = arith.constant 0 : i32
    %c127_i32 = arith.constant 127 : i32
    %6 = vector.broadcast %c0_i32 : i32 to vector<8x128xi32>
    %7 = arith.maxsi %6, %5 : vector<8x128xi32>
    %8 = vector.broadcast %c127_i32 : i32 to vector<8x128xi32>
    %9 = arith.minsi %8, %7 : vector<8x128xi32>
    %10 = vector.shape_cast %9 : vector<8x128xi32> to vector<8x128x1xi32>
    %11 = vector.shape_cast %10 : vector<8x128x1xi32> to vector<8x128xi32>
    %12 = tpu.dynamic_gather %3[%11] in [1] : vector<8x128xf32>, vector<8x128xi32> -> vector<8x128xf32>
    %c0_5 = arith.constant 0 : index
    %c0_6 = arith.constant 0 : index
    %c0_7 = arith.constant 0 : index
    %13 = vector.load %arg4[%c0_5, %c0_6, %c0_7] : memref<1x8x128xf32, #tpu.memory_space<vmem>>, vector<1x8x128xf32>
    %14 = vector.shape_cast %13 : vector<1x8x128xf32> to vector<8x128xf32>
    %15 = vector.shape_cast %12 : vector<8x128xf32> to vector<1x8x128xf32>
    tpu.vector_store %arg4[%c0_5, %c0_6, %c0_7], %15 {strides = array<i32>} : memref<1x8x128xf32, #tpu.memory_space<vmem>>, vector<1x8x128xf32>,
    return
  }
  func.func @transform_0(%arg0: i32, %arg1: i32) -> (i32, i32, i32) {
    %c0_i32 = arith.constant 0 : i32
    %c0_i32_0 = arith.constant 0 : i32
    %c0_i32_1 = arith.constant 0 : i32
    return %arg0, %c0_i32, %c0_i32_0 : i32, i32, i32
  }
  func.func @transform_1(%arg0: i32, %arg1: i32) -> (i32, i32, i32) {
    %c0_i32 = arith.constant 0 : i32
    %c0_i32_0 = arith.constant 0 : i32
    return %arg0, %arg1, %c0_i32 : i32, i32, i32
  }
  func.func @transform_2(%arg0: i32, %arg1: i32) -> (i32, i32, i32) {
    %c0_i32 = arith.constant 0 : i32
    %c0_i32_0 = arith.constant 0 : i32
    return %arg0, %arg1, %c0_i32 : i32, i32, i32
  }
}

</mosaic_0001>

<bundles_post_ra>
// kernel: tpu_custom_call.1
= control target key start
LH: loop header
LB: loop body
LE: loop exit
PB: predicated region body
PF: predicated region fallthrough
CT: control target
= control target key end

     0   :  { %7 = vsyncpa [#allocation3], 0  ;;  %s807_s0 = inlined_call_operand.hbm [shape: f32[2,1,128], index: 0, kind: input, shape index: {}]   ;;  %s808_s1 = inlined_call_operand.hbm [shape: s32[2,8,128], index: 1, kind: input, shape index: {}]   ;;  %s809_s2 = inlined_call_operand.hbm [shape: f32[2,8,128], index: 2, kind: output, shape index: {}]  }
   0x1   :  { %9 = vsyncpa [#allocation3 + $0x1], 0 }
   0x2   :  { %10 = vsyncpa [#allocation6], 0 }
   0x3   :  { %12 = vsyncpa [#allocation6 + $0x1], 0 }
   0x4   :  { %13 = vsyncpa [#allocation4], 0 }
   0x5   :  { %15 = vsyncpa [#allocation4 + $0x1], 0  ;;  %s590_s9 = smov 0   ;;  %s592_s10 = smov 0  }
   0x6   :  { %s594_s11 = smov 0   ;;  %s596_s12 = smov 0  }
   0x7   :  { %s598_s13 = smov 0   ;;  %s600_s14 = smov 0  }
   0x8 LB: > { %s341_s15 = sadd.s32 4294967295, %s570_s14   ;;  %s342_s16 = sadd.s32 4294967294, %s570_s14   ;;  %s570_s14 = sphi %s600_s14, %s21_s14   ;;  %s566_s13 = sphi %s598_s13, %s829_s13   ;;  %s562_s12 = sphi %s596_s12, %s828_s12   ;;  %s558_s11 = sphi %s594_s11, %s827_s11   ;;  %s554_s10 = sphi %s592_s10, %s826_s10   ;;  %s550_s9 = sphi %s590_s9, %s825_s9  }
   0x9   : > { %s33_s17 = sadd.s32 1, %s566_s13  ;;  %s40_s18 = sadd.s32 1, %s558_s11 }
   0xa   : > { %p35_p0 = scmp.ge.s32.totalorder %s33_s17, 2  ;;  %p47_p1 = scmp.ne.s32.totalorder %s558_s11, %s554_s10 }
   0xb   : > { %p48_p2 = scmp.eq.s32.totalorder %s570_s14, 0  ;;  %p53_p3 = scmp.ne.s32.totalorder %s554_s10, %s550_s9 }
   0xc   : > { %s831_s17 = smov (%p35_p0, %s33_s17), 0  ;;  %p54_p5 = scmp.eq.s32.totalorder %s341_s15, 0 }
   0xd   : > { %p631_p4 = por %p48_p2, %p47_p1  ;;  %s37_s20 = ssub.s32 %s566_s13, %s831_s17 }
   0xe   : > { %p107_p6 = scmp.eq.s32.totalorder %s341_s15, 1  ;;  %p38_p7 = scmp.eq.s32.totalorder %s37_s20, 0 }
   0xf   : > { %p637_p8 = por %p54_p5, %p53_p3  ;;  %p113_p10 = scmp.eq.s32.totalorder %s342_s16, 1 }
  0x10   : > { %p641_p9 = por %p107_p6, %p47_p1  ;;  %p373_p13 = scmp.lt.s32.totalorder %s570_s14, 2 }
  0x11   : > { %s813_s21 = scalar_select %p637_p8, 1, 0 }
  0x12   : > { %s814_s22 = scalar_select %p641_p9, 1, 0 }
  0x13   : > { %s646_s23 = scalar_select %p38_p7, %s558_s11, %s40_s18  }
  0x14   : > { %p648_p11 = por %p113_p10, %p53_p3  ;;  %s655_s25 = sand.u32 1, %s558_s11  }
  0x15   : > { %s345_s26 = sshll.u32 %s566_s13, 4  ;;  %s136_s27 = scalar_lea.vmem [#allocation2], %s655_s25 }
  0x16   : > { %s815_s24 = scalar_select %p648_p11, 1, 0 }
  0x17   : > { %s143_s28 = sshll.u32 %s136_s27, 4  ;;  %s662_s3 = scalar_lea.hbm %s807_s0, %s345_s26  ;;  %s664_s28 = int_to_ptr.vmem [resolvable:$true] %s143_s28 }
  0x18   : > { %p668_p0 = pnand %p373_p13, %p631_p4  ;;  %s346_s5 = sshll.u32 %s655_s25, 3 }
  0x19   : > { %s134_s6 = scalar_lea.sflag [#allocation3], %s655_s25  ;;  %s424_s7 = scalar_lea.hbm %s662_s3, 16 }
  0x1a   : > { %p425_p3 = scmp.ne.s32.totalorder %s662_s3, %s424_s7  ;;  %p426_p5 = pneg %p668_p0 }
  0x1b   : > { %s429_s16 = scalar_lea.hbm %s807_s0, 32  ;;  %p430_p4 = scmp.lt.u32.totalorder %s662_s3, %s807_s0 }
  0x1c   : > { %p427_p6 = pnand %p426_p5, %p425_p3  ;;  %p431_p10 = scmp.lt.u32.totalorder %s429_s16, %s424_s7 }
  0x1d   : > { %p433_p12 = scmp.lt.u32.totalorder %s424_s7, %s662_s3 }
  0x1e   : > { %p428_p7 = pneg %p427_p6  ;;  %p432_p13 = por %p431_p10, %p430_p4 }
  0x20   : > { %p434_p1 = por %p433_p12, %p432_p13 }
  0x22   : > { %p435_p2 = pnand %p434_p1, %p428_p7 }
  0x24   : > { %438 = shalt.err (!%p435_p2)
}
  0x25   : > { %s439_s20 = scalar_lea.vmem %s664_s28, 16  ;;  %s572_s26 = smov [#allocation2]  }
  0x26   : > { %p440_p3 = scmp.ne.s32.totalorder %s664_s28, %s439_s20  ;;  %s444_s27 = sshll.u32 %s572_s26, 4  ;;  %s445_s27 = int_to_ptr.vmem [resolvable:$false] %s444_s27 }
  0x27   : > { %s446_s29 = scalar_lea.vmem %s445_s27, 32  ;;  %p447_p9 = scmp.lt.s32.totalorder %s664_s28, %s445_s27 }
  0x28   : > { %p442_p6 = pnand %p440_p3, %p426_p5  ;;  %p448_p4 = scmp.lt.s32.totalorder %s446_s29, %s439_s20 }
  0x2a   : > { %p443_p11 = pneg %p442_p6  ;;  %p449_p10 = por %p448_p4, %p447_p9 }
  0x2c   : > { %p450_p12 = pnand %p449_p10, %p443_p11 }
  0x2e   : > { %453 = shalt.err (!%p450_p12)
}
  0x2f   : > { %365 = dma.hbm_to_vmem [thread:$0]  (!%p668_p0), %s662_s3, 16, %s664_s28, %s134_s6  }
  0x30   : > { %p817_p1 = scmp.lt.s32.totalorder %s570_s14, 3  ;;  %p818_p2 = scmp.ge.s32.totalorder %s570_s14, 1 }
  0x31   : > { %s347_s7 = sshll.u32 %s566_s13, 7  ;;  %s154_s8 = scalar_lea.vmem [#allocation5], %s346_s5 }
  0x32   : > { %p705_p7 = pnand %p818_p2, %p817_p1  ;;  %s162_s15 = sshll.u32 %s154_s8, 4  ;;  %s163_s15 = int_to_ptr.vmem [resolvable:$true] %s162_s15 }
  0x33   : > { %s715_s19 = scalar_lea.hbm %s808_s1, %s347_s7  ;;  %s151_s28 = scalar_lea.sflag [#allocation6], %s655_s25 }
  0x34   : > { %s819_s30 = scalar_select %p705_p7, 1, 0 }
  0x35   : > { %s454_s3 = scalar_lea.hbm %s715_s19, 128  ;;  %s459_s20 = scalar_lea.hbm %s808_s1, 256 }
  0x36   : > { %p455_p9 = scmp.ne.s32.totalorder %s715_s19, %s454_s3  ;;  %p460_p3 = scmp.lt.u32.totalorder %s715_s19, %s808_s1 }
  0x37   : > { %p461_p6 = scmp.lt.u32.totalorder %s459_s20, %s454_s3  ;;  %p463_p10 = scmp.lt.u32.totalorder %s454_s3, %s715_s19 }
  0x38   : > { %p457_p11 = pnand %p455_p9, %p426_p5 }
  0x39   : > { %p462_p4 = por %p461_p6, %p460_p3 }
  0x3a   : > { %p458_p13 = pneg %p457_p11 }
  0x3b   : > { %p464_p12 = por %p463_p10, %p462_p4 }
  0x3d   : > { %p465_p1 = pnand %p464_p12, %p458_p13 }
  0x3f   : > { %468 = shalt.err (!%p465_p1)
}
  0x40   : > { %s469_s25 = scalar_lea.vmem %s163_s15, 128  ;;  %s573_s29 = smov [#allocation5]  }
  0x41   : > { %p470_p2 = scmp.ne.s32.totalorder %s163_s15, %s469_s25  ;;  %s474_s7 = sshll.u32 %s573_s29, 4  ;;  %s475_s7 = int_to_ptr.vmem [resolvable:$false] %s474_s7 }
  0x42   : > { %s476_s8 = scalar_lea.vmem %s475_s7, 256  ;;  %p477_p8 = scmp.lt.s32.totalorder %s163_s15, %s475_s7 }
  0x43   : > { %p472_p9 = pnand %p470_p2, %p426_p5  ;;  %p478_p7 = scmp.lt.s32.totalorder %s476_s8, %s469_s25 }
  0x45   : > { %p473_p11 = pneg %p472_p9  ;;  %p479_p3 = por %p478_p7, %p477_p8 }
  0x47   : > { %p480_p6 = pnand %p479_p3, %p473_p11 }
  0x49   : > { %483 = shalt.err (!%p480_p6)
}
  0x4a   : > { %368 = dma.hbm_to_vmem [thread:$0]  (!%p668_p0), %s715_s19, 128, %s163_s15, %s151_s28  }
  0x4b   : > { %p820_p13 = scmp.ne.s32.totalorder %s819_s30, 0 }
  0x4c   : > { %s740_s16 = sand.u32 (!%p820_p13), 1, %s554_s10   ;;  %p821_p5 = scmp.ne.s32.totalorder (!%p820_p13), %s813_s21, 0 }
  0x4d   : > { %171 = sbr.rel (%p820_p13) target bundleno = 239 (0xef), region = 28  ;;  %s174_s18 = scalar_lea.sflag (!%p820_p13), [#allocation3], %s740_s16 }
  0x4e   : > { %s176_s3 = scalar_lea.vmem (!%p820_p13), [#allocation2], %s740_s16 }
  0x54   : > { %537 = dma.done.wait (%p821_p5), %s174_s18, 16  }
  0x55   : > { %539 = vsyncadd (%p821_p5), %s174_s18, 4294967280  ;;  %s349_s4 = sshll.u32 %s740_s16, 3  ;;  %s182_s15 = scalar_lea.sflag [#allocation6], %s740_s16 }
  0x56   : > { %s185_s30 = scalar_lea.vmem [#allocation5], %s349_s4 }
  0x57   : > { %541 = dma.done.wait (%p821_p5), %s182_s15, 128  }
  0x58   : > { %543 = vsyncadd (%p821_p5), %s182_s15, 4294967168  ;;  %v217_v0 = vld [vmem:[%s185_s30] sm:$0xff]  ;;  %v351_v3 = vld [vmem:[%s176_s3] ss:$0 sm:$0xff]  ;;  %s209_s19 = scalar_lea.vmem [#allocation7], %s349_s4  ;;  %s353_s6 = sshll.u32 %s562_s12, 7 }
  0x59   : > { %vm218_vm0 = vcmp.gt.s32.totalorder %v217_v0, 0  ;;  %s241_s28 = sshll.u32 %s209_s19, 4  ;;  %s760_s21 = scalar_lea.hbm %s809_s2, %s353_s6  ;;  %s755_s28 = int_to_ptr.vmem [resolvable:$true] %s241_s28 }
  0x5a   : > { %v219_v1 = vsel %vm218_vm0, %v217_v0, 0  ;;  %s227_s26 = scalar_lea.sflag [#allocation4], %s740_s16  ;;  %s484_s27 = scalar_lea.vmem %s755_s28, 128 }
  0x5b   : > { %vm220_vm1 = vcmp.lt.s32.totalorder %v219_v1, 127  ;;  %p485_p8 = scmp.ne.s32.totalorder %s755_s28, %s484_s27  ;;  %p822_p0 = scmp.ne.s32.totalorder %s814_s22, 0 }
  0x5c   : > { %v221_v2 = vsel %vm220_vm1, %v219_v1, 127  ;;  %s574_s25 = smov [#allocation7]  }
  0x5d   : > { %423 = vset.pattern.permute.xlu0 %v221_v2  ;;  %p486_p7 = pnand %p485_p8, %p822_p0  ;;  %s488_s12 = sshll.u32 %s574_s25, 4  ;;  %s489_s12 = int_to_ptr.vmem [resolvable:$false] %s488_s12 }
  0x5e   : > { %s490_s29 = scalar_lea.vmem %s489_s12, 256  ;;  %p491_p10 = scmp.lt.s32.totalorder %s755_s28, %s489_s12 }
  0x5f   : > { %p487_p4 = pneg %p486_p7  ;;  %p492_p12 = scmp.lt.s32.totalorder %s490_s29, %s484_s27 }
  0x61   : > { %223 = vperm.xlu0 %423, %v351_v3   ;;  %p493_p1 = por %p492_p12, %p491_p10 }
  0x63   : > { %p494_p2 = pnand %p493_p1, %p487_p4 }
  0xe0   : > { %v224_v4 = vpop.permute.xlu0 %223 }
  0xe1   : > { %225 = vst [vmem:[%s209_s19] sm:$0xff] %v224_v4 }
  0xe2   : > { %497 = shalt.err (!%p494_p2)
}
  0xe3   : > { %s498_s7 = scalar_lea.hbm %s760_s21, 128  ;;  %s502_s18 = scalar_lea.hbm %s809_s2, 256 }
  0xe4   : > { %p499_p9 = scmp.ne.s32.totalorder %s760_s21, %s498_s7  ;;  %p503_p6 = scmp.lt.u32.totalorder %s760_s21, %s809_s2 }
  0xe5   : > { %p504_p13 = scmp.lt.u32.totalorder %s502_s18, %s498_s7  ;;  %p506_p8 = scmp.lt.u32.totalorder %s498_s7, %s760_s21 }
  0xe6   : > { %p500_p11 = pnand %p499_p9, %p822_p0 }
  0xe7   : > { %p505_p5 = por %p504_p13, %p503_p6 }
  0xe8   : > { %p501_p3 = pneg %p500_p11 }
  0xe9   : > { %p507_p7 = por %p506_p8, %p505_p5 }
  0xeb   : > { %p508_p4 = pnand %p507_p7, %p501_p3 }
  0xed   : > { %511 = shalt.err (!%p508_p4)
}
  0xee   : > { %360 = dma.vmem_to_hbm [thread:$0]  (%p822_p0), %s755_s28, 128, %s760_s21, %s227_s26  }
  0xef PF: > { %s253_s15 = sand.u32 1, %s550_s9   ;;  %p823_p10 = scmp.ne.s32.totalorder %s815_s24, 0 }
  0xf0   : > { %p824_p12 = scmp.ge.s32.totalorder %s570_s14, 2  ;;  %s254_s30 = scalar_lea.sflag [#allocation4], %s253_s15 }
  0xf2   : > { %p370_p1 = pnand %p824_p12, %p823_p10 }
  0xf4   : > { %545 = dma.done.wait (!%p370_p1), %s254_s30, 128  }
  0xf5   : > { %547 = vsyncadd (!%p370_p1), %s254_s30, 4294967168  ;;  %s21_s14 = sadd.s32 1, %s570_s14   ;;  %s825_s9 = smov %s554_s10 }
  0xf6   : > { %p18_p2 = scmp.ge.s32.totalorder %s21_s14, 4   ;;  %s826_s10 = smov %s558_s11 }
  0xf7   : > { %s827_s11 = smov %s646_s23  ;;  %s828_s12 = smov %s566_s13 }
  0xf8   : > { %s829_s13 = smov %s831_s17  ;;  %20 = sbr.rel (!%p18_p2) target bundleno = 8 (0x8), region = 86 }
  0xff   :  { %259 = vsyncpa [#allocation3], 1 }
 0x100   :  { %261 = vsyncpa [#allocation3 + $0x1], 1 }
 0x101   :  { %262 = vsyncpa [#allocation6], 1 }
 0x102   :  { %264 = vsyncpa [#allocation6 + $0x1], 1 }
 0x103   :  { %265 = vsyncpa [#allocation4], 1 }
 0x104   :  { %267 = vsyncpa [#allocation4 + $0x1], 1 }

</bundles_post_ra>
